<compile_context>
chip_gen: v6e
topology: v6e:2x2x1
jax: 0.10.0
libtpu: 0.0.40
codegen_flags: <defaults>
</compile_context>

<pallas_src>
import functools
import math

import jax
import jax.numpy as jnp
from jax import lax
from jax.experimental import pallas as pl
from jax.experimental.pallas import tpu as pltpu

LANE = 128


def _round_up(v, m):
    return ((v + m - 1) // m) * m


def _pad_channels(x, c_target):
    c = x.shape[-1]
    if c == c_target:
        return x
    return jnp.pad(x, ((0, 0),) * (x.ndim - 1) + ((0, c_target - c),))


def _vmem_limit_bytes(block_bytes):
    """Per-generation VMEM request: enough for the (double buffered) blocks,
    capped at ~85% of the physical VMEM (v7x: 64 MiB -> ~54 MiB cap; on
    v5e/v6e the 128 MiB allows blocks past the 64 MiB default scoped limit)."""
    phys = 64 * 2 ** 20                              # conservative fallback
    try:
        phys = int(getattr(pltpu.get_tpu_info(), "vmem_capacity_bytes", phys))
    except Exception:
        pass
    want = max(32 * 2 ** 20, int(2.5 * block_bytes) + (8 << 20))
    return int(min(want, int(0.85 * phys)))


# ---------------------------------------------------------------------------
# Fused 3x3 conv kernel: in-kernel spatial padding (reflect/zero) + im2col
# (3 staging buffers, 9 MXU dots) + bias + LeakyReLU (+ fused ResBlock tail).
#   grid = (batch, out-channel tiles)   -- both axes independent ("parallel")
# ---------------------------------------------------------------------------
def _make_conv3x3_kernel(*, out_h, out_w, k_chunk, n_chunks, neg_slope,
                         mxu_dtype, pad_mode, fuse_tail, has_residual):
    out_hw = out_h * out_w

    def body(x_ref, w_ref, b_ref, o_ref, acc_ref, y_ref):
        # No K grid axis -> every (batch, out-tile) step owns its accumulator.
        acc_ref[...] = jnp.zeros_like(acc_ref)

        for kc in range(n_chunks):                       # static, unrolled
            ks = kc * k_chunk
            # Cast to the MXU input dtype ONCE per K-chunk (not per tap).
            xk = x_ref[:, :, ks:ks + k_chunk].astype(mxu_dtype)

            # Build the spatially padded chunk in-kernel (reflection for
            # conv1, zero halo for conv2) -- no jnp.pad slab pass over HBM.
            if pad_mode == "reflect":
                left = xk[:, 1:2, :]
                right = xk[:, out_w - 2:out_w - 1, :]
            else:                                        # zero halo
                left = jnp.zeros((out_h, 1, k_chunk), mxu_dtype)
                right = left
            xc = jnp.concatenate([left, xk, right], axis=1)    # (H, W+2, k)
            if pad_mode == "reflect":
                top = xc[1:2]
                bot = xc[out_h - 2:out_h - 1]
            else:
                top = jnp.zeros((1, out_w + 2, k_chunk), mxu_dtype)
                bot = top
            xp = jnp.concatenate([top, xc, bot], axis=0)       # (H+2, W+2, k)

            # In-kernel im2col: only 3 dx-shifted staging copies per K-chunk;
            # the dy windows below are contiguous, sublane-aligned slices of
            # them (out_w % 8 == 0), i.e. essentially free.
            for dx in range(3):
                stage = xp[:, dx:dx + out_w, :].reshape(
                    (out_h + 2) * out_w, k_chunk)
                for dy in range(3):
                    xs = stage[dy * out_w:dy * out_w + out_hw, :]
                    wv = w_ref[dy, dx]                          # (Cin, tn)
                    if n_chunks > 1:
                        wv = wv[ks:ks + k_chunk, :]
                    # Accumulate straight into the f32 VMEM scratch (keeps the
                    # live partial out of the 64-entry vreg file -> no spills).
                    acc_ref[...] += jnp.dot(
                        xs, wv, preferred_element_type=jnp.float32)

        # f32 epilogue: bias + LeakyReLU (v5e-safe: no bf16 VPU math needed).
        z = acc_ref[...] + b_ref[...]
        z = jnp.where(z >= 0.0, z, neg_slope * z)
        z = z.reshape(out_h, out_w, z.shape[-1])

        if fuse_tail:
            # conv2 tail, fused: the true 3x3 VALID output of the unpadded
            # input lives in rows/cols 1..out-2 of this zero-halo conv output;
            # its ReflectionPad2d(1) is exactly "overwrite the border rows and
            # cols with the ones two steps in".  Then add the shortcut branch.
            row = lax.broadcasted_iota(jnp.int32, z.shape, 0)
            col = lax.broadcasted_iota(jnp.int32, z.shape, 1)
            z = jnp.where(row == 0, z[2:3, :, :], z)
            z = jnp.where(row == out_h - 1, z[out_h - 3:out_h - 2, :, :], z)
            z = jnp.where(col == 0, z[:, 2:3, :], z)
            z = jnp.where(col == out_w - 1, z[:, out_w - 3:out_w - 2, :], z)
            if y_ref is not None:
                z = z + y_ref[...].astype(jnp.float32)     # fused residual add
        o_ref[...] = z.astype(o_ref.dtype)

    if has_residual:
        def kernel(x_ref, w_ref, b_ref, y_ref, o_ref, acc_ref):
            body(x_ref, w_ref, b_ref, o_ref, acc_ref, y_ref)
    else:
        def kernel(x_ref, w_ref, b_ref, o_ref, acc_ref):
            body(x_ref, w_ref, b_ref, o_ref, acc_ref, None)
    return kernel


def conv3x3_fused(x, w, b, *, pad_mode, fuse_tail=False, residual=None,
                  out_dtype=jnp.bfloat16, mxu_dtype=jnp.bfloat16,
                  neg_slope=0.2, tile_n=None):
    """Fused same-size 3x3 conv for the ResBlock.

    x        : (B, H, W, Cin) NHWC, unpadded, Cin % 128 == 0.
    w        : (3, 3, Cin, Cout) HWIO, static scales already folded in.
    b        : (Cout,) f32 bias.
    pad_mode : 'reflect' -> ReflectionPad2d(1) + conv          (conv1 branch)
               'zero'    -> zero halo; borders rebuilt by the fused tail
                            (conv2 branch).
    fuse_tail: conv2 tail in the epilogue (reflection border fix + residual).
    Returns (B, H, W, Cout) in out_dtype.
    """
    B, H, W, Cin = x.shape
    Cout = w.shape[3]
    out_h, out_w, out_hw = H, W, H * W
    assert out_w % 8 == 0 and out_h >= 4 and out_w >= 4, (
        "TODO(synk): support widths not 8-aligned / maps smaller than 4x4")
    assert Cin % LANE == 0 and Cout % LANE == 0
    assert residual is None or fuse_tail

    if tile_n is None:
        # v6e/v7x MXU is 2x256x256 -> prefer 256-wide output tiles; 128 is
        # already a perfect match for the v5e 4x128^2 MXU.
        tile_n = 256 if Cout % 256 == 0 else LANE
    tn = min(tile_n, Cout)
    assert Cout % tn == 0
    nt = Cout // tn
    k_chunk = Cin if Cin <= 256 else (256 if Cin % 256 == 0 else LANE)
    n_chunks = Cin // k_chunk

    w = w.astype(mxu_dtype)                 # bf16 weights halve weight DMA
    b = b.astype(jnp.float32).reshape(1, Cout)

    # Image block is independent of the out-channel grid axis nn -> Pallas
    # keeps it resident instead of re-streaming it nt times from HBM.
    x_spec = pl.BlockSpec((None, H, W, Cin), lambda bb, nn: (bb, 0, 0, 0))
    w_map = lambda bb, nn: (0, 0, 0, nn)
    w_spec = pl.BlockSpec((3, 3, Cin, tn), w_map)
    if nt >= 3:
        try:   # deeper weight pipelining hides the re-fetch at batch edges
            w_spec = pl.BlockSpec((3, 3, Cin, tn), w_map,
                                  pipeline_mode=pl.Buffered(3))
        except Exception:
            pass
    b_spec = pl.BlockSpec((1, tn), lambda bb, nn: (0, nn))

    in_specs = [x_spec, w_spec, b_spec]
    inputs = [x, w, b]
    if residual is not None:
        in_specs.append(pl.BlockSpec((None, out_h, out_w, tn),
                                     lambda bb, nn: (bb, 0, 0, nn)))
        inputs.append(residual)

    kern = _make_conv3x3_kernel(
        out_h=out_h, out_w=out_w, k_chunk=k_chunk, n_chunks=n_chunks,
        neg_slope=float(neg_slope), mxu_dtype=mxu_dtype, pad_mode=pad_mode,
        fuse_tail=fuse_tail, has_residual=residual is not None)

    x_b = jnp.dtype(x.dtype).itemsize
    w_b = jnp.dtype(mxu_dtype).itemsize
    o_b = jnp.dtype(out_dtype).itemsize
    r_b = 0 if residual is None else jnp.dtype(residual.dtype).itemsize
    block_bytes = (H * W * Cin * x_b + 9 * Cin * tn * w_b + out_hw * tn * 4
                   + out_hw * tn * o_b + out_hw * tn * r_b)
    cost = pl.CostEstimate(
        flops=2 * B * out_hw * 9 * Cin * Cout,
        transcendentals=0,
        bytes_accessed=(x.size * x_b + int(w.size) * w_b + int(b.size) * 4
                        + B * out_hw * Cout * o_b
                        + (0 if residual is None else residual.size * r_b)))

    # TODO(synk): for large feature maps (>= ~64x64 on v7x) add output-row
    # tiling with a 2-row halo plus an in-kernel K loop so the image block and
    # the accumulator fit v7x's 64 MiB VMEM and its 2 TensorCores get more
    # parallel blocks.
    return pl.pallas_call(
        kern,
        out_shape=jax.ShapeDtypeStruct((B, out_h, out_w, Cout), out_dtype),
        grid=(B, nt),
        in_specs=in_specs,
        out_specs=pl.BlockSpec((None, out_h, out_w, tn),
                               lambda bb, nn: (bb, 0, 0, nn)),
        scratch_shapes=[pltpu.VMEM((out_hw, tn), jnp.float32)],
        compiler_params=pltpu.CompilerParams(
            dimension_semantics=("parallel", "parallel"),
            vmem_limit_bytes=_vmem_limit_bytes(block_bytes)),
        cost_estimate=cost,
    )(*inputs)


# ---------------------------------------------------------------------------
# Tiled matmul + LeakyReLU (shortcut 1x1 conv, no bias, scale folded into w).
# ---------------------------------------------------------------------------
def _matmul_act_kernel(x_ref, w_ref, o_ref, acc_ref, *, neg_slope, mxu_dtype):
    k = pl.program_id(2)

    @pl.when(k == 0)
    def _init():
        acc_ref[...] = jnp.zeros_like(acc_ref)

    acc_ref[...] += jnp.dot(x_ref[...].astype(mxu_dtype), w_ref[...],
                            preferred_element_type=jnp.float32)

    @pl.when(k == pl.num_programs(2) - 1)
    def _finalize():
        out = acc_ref[...]
        out = jnp.where(out >= 0.0, out, neg_slope * out)
        o_ref[...] = out.astype(o_ref.dtype)


def matmul_act(x2d, w2d, *, out_dtype=jnp.bfloat16, mxu_dtype=jnp.bfloat16,
               neg_slope=0.2, tile_m=256, tile_n=None, tile_k=None):
    M, K = x2d.shape
    N = w2d.shape[1]
    assert K % LANE == 0 and N % LANE == 0
    if tile_n is None:
        tile_n = 256 if N % 256 == 0 else LANE
    if tile_k is None:
        tile_k = 256 if K % 256 == 0 else LANE
    tn, tk = min(tile_n, N), min(tile_k, K)
    assert N % tn == 0 and K % tk == 0

    # Pad M to whole tiles (never fall back to one huge M block).
    Mp = _round_up(M, tile_m)
    tm = min(tile_m, Mp)
    if Mp != M:
        x2d = jnp.pad(x2d, ((0, Mp - M), (0, 0)))
    w2d = w2d.astype(mxu_dtype)

    x_b = jnp.dtype(x2d.dtype).itemsize
    w_b = jnp.dtype(mxu_dtype).itemsize
    o_b = jnp.dtype(out_dtype).itemsize
    block_bytes = tm * tk * x_b + tk * tn * w_b + tm * tn * (4 + o_b)
    cost = pl.CostEstimate(flops=2 * Mp * K * N, transcendentals=0,
                           bytes_accessed=Mp * K * x_b + K * N * w_b
                           + Mp * N * o_b)

    out = pl.pallas_call(
        functools.partial(_matmul_act_kernel, neg_slope=float(neg_slope),
                          mxu_dtype=mxu_dtype),
        out_shape=jax.ShapeDtypeStruct((Mp, N), out_dtype),
        grid=(Mp // tm, N // tn, K // tk),
        in_specs=[pl.BlockSpec((tm, tk), lambda i, j, k: (i, k)),
                  pl.BlockSpec((tk, tn), lambda i, j, k: (k, j))],
        out_specs=pl.BlockSpec((tm, tn), lambda i, j, k: (i, j)),
        scratch_shapes=[pltpu.VMEM((tm, tn), jnp.float32)],
        compiler_params=pltpu.CompilerParams(
            dimension_semantics=("parallel", "parallel", "arbitrary"),
            vmem_limit_bytes=_vmem_limit_bytes(block_bytes)),
        cost_estimate=cost,
    )(x2d, w2d)
    return out[:M] if Mp != M else out


# ---------------------------------------------------------------------------
# Parameters: raw (mirrors the PyTorch module) + prepared (padded, scale-folded)
# ---------------------------------------------------------------------------
def make_resblock_params(in_c, out_c, *, use_wscale=False,
                         wscale_gain=math.sqrt(2.0), key=None):
    hidden = min(in_c, out_c)
    key = jax.random.PRNGKey(0) if key is None else key
    k_sc, k1, k2, kb1, kb2 = jax.random.split(key, 5)
    p = {
        "in_c": in_c, "out_c": out_c, "hidden": hidden,
        "add_shortcut": in_c != out_c,
        # synthetic HWIO weights; biases nonzero to exercise the bias path
        "w1": 0.1 * jax.random.normal(k1, (3, 3, in_c, hidden), jnp.float32),
        "w2": 0.1 * jax.random.normal(k2, (3, 3, hidden, out_c), jnp.float32),
        "b1": 0.05 * jax.random.normal(kb1, (hidden,), jnp.float32),
        "b2": 0.05 * jax.random.normal(kb2, (out_c,), jnp.float32),
        # scale constants exactly as in ResBlock.__init__ / WScaleLayer
        "scale_sc": (wscale_gain / math.sqrt(in_c)) if use_wscale else 1.0,
        "scale1": 1.0 if use_wscale else wscale_gain / math.sqrt(in_c * 9),
        "ws1": wscale_gain / math.sqrt(in_c * 9),
        "scale2": 1.0 if use_wscale else wscale_gain / math.sqrt(hidden * 9),
        "ws2": wscale_gain / math.sqrt(hidden * 9),
    }
    if p["add_shortcut"]:
        p["w_sc"] = 0.1 * jax.random.normal(k_sc, (in_c, out_c), jnp.float32)
    return p


def prepare_pallas_params(p, lane=LANE):
    """Pad channels to lane multiples and fold static scales into the weights."""
    cin_p = _round_up(p["in_c"], lane)
    hid_p = _round_up(p["hidden"], lane)
    cout_p = _round_up(p["out_c"], lane)

    def pad_hwio(w, ci, co):
        return jnp.pad(w, ((0, 0), (0, 0),
                           (0, ci - w.shape[2]), (0, co - w.shape[3])))

    pp = {
        "in_c": p["in_c"], "out_c": p["out_c"], "hidden": p["hidden"],
        "add_shortcut": p["add_shortcut"],
        "cin_p": cin_p, "hid_p": hid_p, "cout_p": cout_p,
        "w1": pad_hwio(p["w1"] * (p["ws1"] / p["scale1"]), cin_p, hid_p),
        "b1": jnp.pad(p["b1"], (0, hid_p - p["hidden"])),
        "w2": pad_hwio(p["w2"] * (p["ws2"] / p["scale2"]), hid_p, cout_p),
        "b2": jnp.pad(p["b2"], (0, cout_p - p["out_c"])),
    }
    if p["add_shortcut"]:
        pp["w_sc"] = jnp.pad(p["w_sc"] * p["scale_sc"],
                             ((0, cin_p - p["in_c"]),
                              (0, cout_p - p["out_c"])))
    return pp


# ---------------------------------------------------------------------------
# ResBlock forward (Pallas version).
# ---------------------------------------------------------------------------
def res_block_forward(x_nchw, pp, *, mxu_dtype=jnp.bfloat16,
                      act_dtype=jnp.bfloat16):
    """mxu_dtype: MXU input dtype (bf16 on every generation, incl. v5e whose
    MXU is bf16-native; accumulation / epilogue stay in f32).
    act_dtype: HBM storage dtype of the inter-kernel activations."""
    n, _, h, w = x_nchw.shape
    # NCHW <-> NHWC, lane padding, storage cast: module boundary only.
    x = jnp.transpose(x_nchw, (0, 2, 3, 1))
    x = _pad_channels(x, pp["cin_p"]).astype(act_dtype)

    # Shortcut branch: y = lrelu(conv1x1(x) * scale)   (bn == Identity).
    if pp["add_shortcut"]:
        y = matmul_act(x.reshape(n * h * w, pp["cin_p"]), pp["w_sc"],
                       out_dtype=act_dtype, mxu_dtype=mxu_dtype)
        y = y.reshape(n, h, w, pp["cout_p"])
    else:
        y = x                               # in_c == out_c -> cin_p == cout_p

    # conv1: ReflectionPad2d(1) + 3x3 conv + wscale + bias + lrelu, one kernel.
    h1 = conv3x3_fused(x, pp["w1"], pp["b1"], pad_mode="reflect",
                       out_dtype=act_dtype, mxu_dtype=mxu_dtype)

    # conv2: 3x3 conv + ReflectionPad2d(1) + wscale + bias + lrelu + residual
    # add, all fused (no pad/crop/add slab passes outside the kernel).
    out = conv3x3_fused(h1, pp["w2"], pp["b2"], pad_mode="zero",
                        fuse_tail=True, residual=y,
                        out_dtype=jnp.float32, mxu_dtype=mxu_dtype)

    out = out[..., :pp["out_c"]]            # drop lane-padding channels
    return jnp.transpose(out, (0, 3, 1, 2))  # -> NCHW


# ---------------------------------------------------------------------------
# Pure-JAX reference (literal transcription of the PyTorch forward).
# ---------------------------------------------------------------------------
def res_block_reference(x_nchw, p):
    lrelu = lambda t: jnp.where(t >= 0, t, 0.2 * t)
    refl = lambda t: jnp.pad(t, ((0, 0), (1, 1), (1, 1), (0, 0)), mode="reflect")
    dn = ("NHWC", "HWIO", "NHWC")
    x = jnp.transpose(x_nchw, (0, 2, 3, 1)).astype(jnp.float32)
    if p["add_shortcut"]:
        w_sc = p["w_sc"].reshape(1, 1, p["in_c"], p["out_c"])
        y = lrelu(lax.conv_general_dilated(x, w_sc, (1, 1), "VALID",
                                           dimension_numbers=dn) * p["scale_sc"])
    else:
        y = x
    hh = lax.conv_general_dilated(refl(x), p["w1"], (1, 1), "VALID",
                                  dimension_numbers=dn)
    hh = lrelu(hh / p["scale1"] * p["ws1"] + p["b1"])
    z = lax.conv_general_dilated(hh, p["w2"], (1, 1), "VALID",
                                 dimension_numbers=dn)
    z = refl(z)
    z = lrelu(z / p["scale2"] * p["ws2"] + p["b2"])
    return jnp.transpose(z + y, (0, 3, 1, 2))


if __name__ == "__main__":
    key = jax.random.PRNGKey(0)
    kx, kp = jax.random.split(key)

    in_c, out_c = 4, 8                    # in != out -> shortcut path exercised
    x = jax.random.normal(kx, (2, in_c, 16, 16), jnp.float32)    # NCHW input

    raw = make_resblock_params(in_c, out_c, key=kp)
    pp = prepare_pallas_params(raw)

    ref = jax.block_until_ready(res_block_reference(x, raw))

    # f32 storage + f32 MXU inputs (tight numerical check).
    out_f32 = jax.block_until_ready(
        res_block_forward(x, pp, mxu_dtype=jnp.float32, act_dtype=jnp.float32))
    assert out_f32.shape == (2, out_c, 16, 16), out_f32.shape
    err32 = float(jnp.max(jnp.abs(out_f32 - ref)))
    assert err32 < 2e-3, err32

    # Default fast path: bf16 MXU inputs (all generations, v5e included) and
    # bf16 inter-kernel activations, with f32 accumulation + f32 epilogue.
    out_bf16 = jax.block_until_ready(res_block_forward(x, pp))
    err16 = float(jnp.max(jnp.abs(out_bf16 - ref)))
    assert err16 < 1e-1, err16

    print("KERNEL_OK")
</pallas_src>

<mosaic_0001>
module attributes {stable_mosaic.version = 11 : i64} {
  func.func @_matmul_act_kernel(%arg0: i32, %arg1: i32, %arg2: i32, %arg3: memref<256x128xf32, #tpu.memory_space<vmem>>, %arg4: memref<128x128xf32, #tpu.memory_space<vmem>>, %arg5: memref<256x128xf32, #tpu.memory_space<vmem>>, %arg6: memref<256x128xf32, #tpu.memory_space<vmem>>) attributes {dimension_semantics = [#tpu.dimension_semantics<parallel>, #tpu.dimension_semantics<parallel>, #tpu.dimension_semantics<arbitrary>], iteration_bounds = array<i64: 2, 1, 1>, scalar_prefetch = 0 : i64, scratch_operands = 1 : i64, tpu.core_type = #tpu.core_type<tc>, window_params = [{transform_indices = @transform_0, window_bounds = array<i64: 256, 128>}, {transform_indices = @transform_1, window_bounds = array<i64: 128, 128>}, {transform_indices = @transform_2, window_bounds = array<i64: 256, 128>}]} {
    %c0_i32 = arith.constant 0 : i32
    %0 = arith.cmpi eq, %arg2, %c0_i32 : i32
    %1 = arith.extui %0 : i1 to i32
    %c0_i32_0 = arith.constant 0 : i32
    %2 = arith.cmpi ne, %1, %c0_i32_0 : i32
    scf.if %2 {
      %cst_10 = arith.constant 0.000000e+00 : f32
      %12 = vector.broadcast %cst_10 : f32 to vector<256x128xf32>
      %c0_11 = arith.constant 0 : index
      %c0_12 = arith.constant 0 : index
      %13 = vector.load %arg6[%c0_11, %c0_12] : memref<256x128xf32, #tpu.memory_space<vmem>>, vector<256x128xf32>
      tpu.vector_store %arg6[%c0_11, %c0_12], %12 {strides = array<i32>} : memref<256x128xf32, #tpu.memory_space<vmem>>, vector<256x128xf32>,
    } else {
    }
    %c0 = arith.constant 0 : index
    %c0_1 = arith.constant 0 : index
    %3 = vector.load %arg6[%c0, %c0_1] : memref<256x128xf32, #tpu.memory_space<vmem>>, vector<256x128xf32>
    %c0_2 = arith.constant 0 : index
    %c0_3 = arith.constant 0 : index
    %4 = vector.load %arg3[%c0_2, %c0_3] : memref<256x128xf32, #tpu.memory_space<vmem>>, vector<256x128xf32>
    %c0_4 = arith.constant 0 : index
    %c0_5 = arith.constant 0 : index
    %5 = vector.load %arg4[%c0_4, %c0_5] : memref<128x128xf32, #tpu.memory_space<vmem>>, vector<128x128xf32>
    %cst = arith.constant dense<0.000000e+00> : vector<256x128xf32>
    %6 = tpu.matmul %4, %5, %cst {dimension_numbers = #tpu.dot_dimension_numbers<[1], [0], [0], [1], [0, 0, 1, 1], [], []>} : vector<256x128xf32>, vector<128x128xf32>, vector<256x128xf32> -> vector<256x128xf32>
    %7 = arith.addf %3, %6 : vector<256x128xf32>
    %c0_6 = arith.constant 0 : index
    %c0_7 = arith.constant 0 : index
    %8 = vector.load %arg6[%c0_6, %c0_7] : memref<256x128xf32, #tpu.memory_space<vmem>>, vector<256x128xf32>
    tpu.vector_store %arg6[%c0_6, %c0_7], %7 {strides = array<i32>} : memref<256x128xf32, #tpu.memory_space<vmem>>, vector<256x128xf32>,
    %c0_i32_8 = arith.constant 0 : i32
    %9 = arith.cmpi eq, %arg2, %c0_i32_8 : i32
    %10 = arith.extui %9 : i1 to i32
    %c0_i32_9 = arith.constant 0 : i32
    %11 = arith.cmpi ne, %10, %c0_i32_9 : i32
    scf.if %11 {
      %c0_10 = arith.constant 0 : index
      %c0_11 = arith.constant 0 : index
      %12 = vector.load %arg6[%c0_10, %c0_11] : memref<256x128xf32, #tpu.memory_space<vmem>>, vector<256x128xf32>
      %cst_12 = arith.constant 0.000000e+00 : f32
      %13 = vector.broadcast %cst_12 : f32 to vector<256x128xf32>
      %14 = arith.cmpf oge, %12, %13 : vector<256x128xf32>
      %cst_13 = arith.constant 2.000000e-01 : f32
      %15 = vector.broadcast %cst_13 : f32 to vector<256x128xf32>
      %16 = arith.mulf %15, %12 : vector<256x128xf32>
      %17 = arith.select %14, %12, %16 : vector<256x128xi1>, vector<256x128xf32>
      %c0_14 = arith.constant 0 : index
      %c0_15 = arith.constant 0 : index
      %18 = vector.load %arg5[%c0_14, %c0_15] : memref<256x128xf32, #tpu.memory_space<vmem>>, vector<256x128xf32>
      tpu.vector_store %arg5[%c0_14, %c0_15], %17 {strides = array<i32>} : memref<256x128xf32, #tpu.memory_space<vmem>>, vector<256x128xf32>,
    } else {
    }
    return
  }
  func.func @transform_0(%arg0: i32, %arg1: i32, %arg2: i32) -> (i32, i32) {
    %c0_i32 = arith.constant 0 : i32
    return %arg0, %arg2 : i32, i32
  }
  func.func @transform_1(%arg0: i32, %arg1: i32, %arg2: i32) -> (i32, i32) {
    %c0_i32 = arith.constant 0 : i32
    return %arg2, %arg1 : i32, i32
  }
  func.func @transform_2(%arg0: i32, %arg1: i32, %arg2: i32) -> (i32, i32) {
    %c0_i32 = arith.constant 0 : i32
    return %arg0, %arg1 : i32, i32
  }
}

</mosaic_0001>

<bundles_post_ra>
// kernel: tpu_custom_call.1
= control target key start
LH: loop header
LB: loop body
LE: loop exit
PB: predicated region body
PF: predicated region fallthrough
CT: control target
= control target key end

     0   :  { %7 = vsyncpa [#allocation4], 0  ;;  %s1578_s0 = inlined_call_operand.hbm [shape: f32[512,128], index: 0, kind: input, shape index: {}]   ;;  %s1579_s1 = inlined_call_operand.hbm [shape: f32[128,128], index: 1, kind: input, shape index: {}]   ;;  %s1580_s2 = inlined_call_operand.hbm [shape: f32[512,128], index: 2, kind: output, shape index: {}]  }
   0x1   :  { %9 = vsyncpa [#allocation4 + $0x1], 0 }
   0x2   :  { %10 = vsyncpa [#allocation7], 0 }
   0x3   :  { %11 = vsyncpa [#allocation5], 0 }
   0x4   :  { %13 = vsyncpa [#allocation5 + $0x1], 0  ;;  %s1318_s9 = smov 0   ;;  %s1320_s10 = smov 0  }
   0x5   :  { %s1322_s11 = smov 0   ;;  %s1324_s12 = smov 0  }
   0x6   :  { %s1326_s13 = smov 0   ;;  %s1328_s14 = smov 0  }
   0x7 LB: > { %s900_s15 = sadd.s32 4294967295, %s1294_s14   ;;  %s901_s16 = sadd.s32 4294967294, %s1294_s14   ;;  %s1294_s14 = sphi %s1328_s14, %s19_s14   ;;  %s1290_s13 = sphi %s1326_s13, %s1600_s13   ;;  %s1286_s12 = sphi %s1324_s12, %s1599_s12   ;;  %s1282_s11 = sphi %s1322_s11, %s1598_s11   ;;  %s1278_s10 = sphi %s1320_s10, %s1597_s10   ;;  %s1274_s9 = sphi %s1318_s9, %s1596_s9  }
   0x8   : > { %p60_p0 = scmp.ne.s32.totalorder %s1278_s10, %s1274_s9  ;;  %p1352_p1 = scmp.eq.s32.totalorder %s900_s15, 0 }
   0x9   : > { %p1356_p2 = scmp.eq.s32.totalorder %s900_s15, 1  ;;  %p120_p3 = scmp.eq.s32.totalorder %s901_s16, 1 }
   0xa   : > { %p1362_p4 = por %p1352_p1, %p60_p0  ;;  %p902_p5 = scmp.ge.s32.totalorder %s1294_s14, 1 }
   0xb   : > { %p1367_p6 = por %p120_p3, %p60_p0  ;;  %p127_p7 = scmp.lt.s32.totalorder %s1294_s14, 3 }
   0xc   : > { %s1585_s19 = scalar_select %p1362_p4, 1, 0 }
   0xd   : > { %s1586_s20 = scalar_select %p1367_p6, 1, 0 }
   0xe   : > { %p1372_p8 = pnand %p902_p5, %p127_p7  ;;  %s1296_s22 = smov [#allocation6]  }
   0xf   : > { %s143_s23 = sshll.u32 %s1296_s22, 4  ;;  %s38_s25 = sadd.s32 1, %s1290_s13  ;;  %s144_s23 = int_to_ptr.vmem [resolvable:$true] %s143_s23 }
  0x10   : > { %p1087_p9 = pneg %p1372_p8  ;;  %s1167_s26 = scalar_lea.vmem %s144_s23, 2048 }
  0x11   : > { %p1168_p13 = scmp.ne.s32.totalorder %s144_s23, %s1167_s26  ;;  %p1175_p5 = scmp.lt.s32.totalorder %s144_s23, %s144_s23 }
  0x12   : > { %p1381_p11 = pnand %p1087_p9, %p1352_p1  ;;  %p1176_p7 = scmp.lt.s32.totalorder %s1167_s26, %s1167_s26 }
  0x14   : > { %p1158_p12 = pneg %p1381_p11  ;;  %p1177_p6 = por %p1176_p7, %p1175_p5 }
  0x16   : > { %p1170_p0 = pnand %p1168_p13, %p1158_p12 }
  0x18   : > { %p1171_p3 = pneg %p1170_p0 }
  0x1a   : > { %p1178_p4 = pnand %p1177_p6, %p1171_p3 }
  0x1c   : > { %1181 = shalt.err (!%p1178_p4)
}
  0x1d   : > { %s1582_s27 = smov 128   ;;  %s1298_s28 = smov 8  }
  0x1e   : > { %1090 = dma.hbm_to_vmem [thread:$0]  (!%p1381_p11), %s1579_s1, 2048, %s144_s23, [#allocation7], %s1582_s27, %s1582_s27, %s1298_s28  }
  0x1f   : > { %p40_p4 = scmp.ge.s32.totalorder %s38_s25, 2  ;;  %s47_s3 = sadd.s32 1, %s1282_s11 }
  0x20   : > { %p54_p6 = scmp.ne.s32.totalorder %s1282_s11, %s1278_s10  ;;  %p55_p9 = scmp.eq.s32.totalorder %s1294_s14, 0 }
  0x21   : > { %s1602_s25 = smov (%p40_p4, %s38_s25), 0  ;;  %p1100_p0 = scmp.lt.s32.totalorder %s1294_s14, 2 }
  0x22   : > { %p1402_p12 = por %p55_p9, %p54_p6  ;;  %p1408_p13 = por %p1356_p2, %p54_p6 }
  0x23   : > { %s42_s6 = ssub.s32 %s1290_s13, %s1602_s25  ;;  %s157_s7 = sand.u32 1, %s1282_s11  }
  0x24   : > { %p45_p11 = scmp.eq.s32.totalorder %s42_s6, 0  ;;  %s905_s8 = sshll.u32 %s157_s7, 8 }
  0x25   : > { %s917_s16 = sshll.u32 %s1290_s13, 12  ;;  %s161_s26 = scalar_lea.vmem [#allocation3], %s905_s8 }
  0x26   : > { %s1417_s15 = scalar_select %p45_p11, %s1282_s11, %s47_s3  }
  0x27   : > { %s168_s24 = scalar_lea.hbm %s1578_s0, %s917_s16  ;;  %s169_s29 = sshll.u32 %s161_s26, 4  ;;  %s170_s29 = int_to_ptr.vmem [resolvable:$true] %s169_s29 }
  0x28   : > { %p1425_p2 = pnand %p1100_p0, %p1402_p12  ;;  %s158_s30 = scalar_lea.sflag [#allocation4], %s157_s7 }
  0x29   : > { %s1195_s6 = scalar_lea.vmem %s170_s29, 4096  ;;  %s1299_s3 = smov [#allocation3]  }
  0x2a   : > { %p1184_p3 = pneg %p1425_p2  ;;  %p1196_p5 = scmp.ne.s32.totalorder %s170_s29, %s1195_s6 }
  0x2b   : > { %s1200_s27 = sshll.u32 %s1299_s3, 4  ;;  %s1201_s27 = int_to_ptr.vmem [resolvable:$false] %s1200_s27 }
  0x2c   : > { %p1198_p7 = pnand %p1196_p5, %p1184_p3  ;;  %s1202_s16 = scalar_lea.vmem %s1201_s27, 8192 }
  0x2d   : > { %p1203_p6 = scmp.lt.s32.totalorder %s170_s29, %s1201_s27  ;;  %p1204_p9 = scmp.lt.s32.totalorder %s1202_s16, %s1195_s6 }
  0x2e   : > { %p1199_p4 = pneg %p1198_p7 }
  0x2f   : > { %p1205_p11 = por %p1204_p9, %p1203_p6 }
  0x31   : > { %p1206_p10 = pnand %p1205_p11, %p1199_p4 }
  0x33   : > { %1209 = shalt.err (!%p1206_p10)
}
  0x34   : > { %s1592_s4 = smov 128   ;;  %181 = sbr.rel (%p1372_p8) target bundleno = 335 (0x14f), region = 28 }
  0x35   : > { %1094 = dma.hbm_to_vmem [thread:$0]  (!%p1425_p2), %s168_s24, 4096, %s170_s29, %s158_s30, %s1592_s4, %s1592_s4, %s1298_s28  }
  0x36   : > { %s1439_s7 = sand.u32 (!%p1372_p8), 1, %s1278_s10   ;;  %p1593_p10 = scmp.ne.s32.totalorder (!%p1372_p8), %s1585_s19, 0 }
  0x37   : > { %s909_s27 = sshll.u32 (!%p1372_p8), %s1439_s7, 8  ;;  %s184_s8 = scalar_lea.sflag (!%p1372_p8), [#allocation4], %s1439_s7 }
  0x38   : > { %s1445_s22 = scalar_lea.vmem (!%p1372_p8), [#allocation3], %s909_s27 }
  0x39   : > { %1261 = dma.done.wait (%p1593_p10), %s184_s8, 4096  }
  0x3a   : > { %1263 = vsyncadd (%p1593_p10), %s184_s8, 4294963200 }
  0x3b   : > { %1265 = dma.done.wait (%p1352_p1), [#allocation7], 2048  }
  0x3c   : > { %1267 = vsyncadd (%p1352_p1), [#allocation7], 4294965248  ;;  %v330_v0 = vld [vmem:[#allocation6 + $0x78] sm:$0xff]  ;;  %v329_v1 = vld [vmem:[#allocation6 + $0x70] sm:$0xff]  ;;  %s1489_s17 = scalar_lea.vmem [#allocation8], %s909_s27  ;;  %s918_s19 = sshll.u32 %s1286_s12, 12 }
  0x3d   : > { %967 = vmatprep.subr.mxu0 %v330_v0  ;;  %1047 = vmatprep.subr.mxu1 %v330_v0  ;;  %v328_v2 = vld [vmem:[#allocation6 + $0x68] sm:$0xff]  ;;  %v327_v3 = vld [vmem:[#allocation6 + $0x60] sm:$0xff]  ;;  %v326_v4 = vld [vmem:[#allocation6 + $0x58] sm:$0xff]  ;;  %s798_s21 = sshll.u32 %s1489_s17, 4  ;;  %s1525_s23 = scalar_lea.hbm %s1580_s2, %s918_s19  ;;  %s1527_s21 = int_to_ptr.vmem [resolvable:$true] %s798_s21 }
  0x3e   : > { %968 = vmatpush3.msra.mxu0 %v330_v0  ;;  %1063 = vmatpush3.msra.mxu1 %v330_v0  ;;  %v325_v5 = vld [vmem:[#allocation6 + $0x50] sm:$0xff]  ;;  %v324_v6 = vld [vmem:[#allocation6 + $0x48] sm:$0xff]  ;;  %v323_v7 = vld [vmem:[#allocation6 + $0x40] sm:$0xff]  ;;  %s784_s24 = scalar_lea.sflag [#allocation5], %s1439_s7  ;;  %s1210_s26 = scalar_lea.vmem %s1527_s21, 4096 }
  0x3f   : > { %969 = vmatprep.subr.mxu0 %v329_v1  ;;  %1048 = vmatprep.subr.mxu1 %v329_v1  ;;  %v322_v8 = vld [vmem:[#allocation6 + $0x38] sm:$0xff]  ;;  %v321_v9 = vld [vmem:[#allocation6 + $0x30] sm:$0xff]  ;;  %v320_v10 = vld [vmem:[#allocation6 + $0x28] sm:$0xff]  ;;  %p1211_p1 = scmp.ne.s32.totalorder %s1527_s21, %s1210_s26  ;;  %s1300_s29 = smov [#allocation8]  }
  0x40   : > { %970 = vmatpush3.msra.mxu0 %v329_v1  ;;  %1064 = vmatpush3.msra.mxu1 %v329_v1  ;;  %v319_v11 = vld [vmem:[#allocation6 + $0x20] sm:$0xff]  ;;  %v318_v12 = vld [vmem:[#allocation6 + $0x18] sm:$0xff]  ;;  %v317_v13 = vld [vmem:[#allocation6 + $0x10] sm:$0xff]  ;;  %s1214_s18 = sshll.u32 %s1300_s29, 4  ;;  %s1215_s18 = int_to_ptr.vmem [resolvable:$false] %s1214_s18 }
  0x41   : > { %971 = vmatprep.subr.mxu0 %v328_v2  ;;  %1049 = vmatprep.subr.mxu1 %v328_v2  ;;  %v316_v14 = vld [vmem:[#allocation6 + $0x8] sm:$0xff]  ;;  %v315_v15 = vld [vmem:[#allocation6] sm:$0xff]  ;;  %v285_v20 = vld [vmem:[%s1445_s22 + $0x10] sm:$0xff]  ;;  %p1212_p8 = pnand %p1211_p1, %p1408_p13  ;;  %s1216_s30 = scalar_lea.vmem %s1215_s18, 8192 }
  0x42   : > { %972 = vmatpush3.msra.mxu0 %v328_v2  ;;  %1065 = vmatpush3.msra.mxu1 %v328_v2  ;;  %v283_v16 = vld [vmem:[%s1445_s22] sm:$0xff]  ;;  %v284_v18 = vld [vmem:[%s1445_s22 + $0x8] sm:$0xff]  ;;  %v301_v21 = vld [vmem:[%s1445_s22 + $0x90] sm:$0xff]  ;;  %p1217_p0 = scmp.lt.s32.totalorder %s1527_s21, %s1215_s18  ;;  %p1218_p2 = scmp.lt.s32.totalorder %s1216_s30, %s1210_s26 }
  0x43   : > { %973 = vmatprep.subr.mxu0 %v327_v3  ;;  %1050 = vmatprep.subr.mxu1 %v327_v3  ;;  %v299_v17 = vld [vmem:[%s1445_s22 + $0x80] sm:$0xff]  ;;  %v300_v19 = vld [vmem:[%s1445_s22 + $0x88] sm:$0xff]  ;;  %v286_v22 = vld [vmem:[%s1445_s22 + $0x18] sm:$0xff]  ;;  %p1213_p12 = pneg %p1212_p8 }
  0x44   : > { %974 = vmatpush3.msra.mxu0 %v327_v3  ;;  %1066 = vmatpush3.msra.mxu1 %v327_v3  ;;  %v302_v23 = vld [vmem:[%s1445_s22 + $0x98] sm:$0xff]  ;;  %v287_v24 = vld [vmem:[%s1445_s22 + $0x20] sm:$0xff]  ;;  %v288_v26 = vld [vmem:[%s1445_s22 + $0x28] sm:$0xff]  ;;  %p1219_p3 = por %p1218_p2, %p1217_p0 }
  0x45   : > { %975 = vmatprep.subr.mxu0 %v326_v4  ;;  %1051 = vmatprep.subr.mxu1 %v326_v4  ;;  %v303_v25 = vld [vmem:[%s1445_s22 + $0xa0] sm:$0xff]  ;;  %v304_v27 = vld [vmem:[%s1445_s22 + $0xa8] sm:$0xff]  ;;  %v289_v28 = vld [vmem:[%s1445_s22 + $0x30] sm:$0xff] }
  0x46   : > { %976 = vmatpush3.msra.mxu0 %v326_v4  ;;  %1067 = vmatpush3.msra.mxu1 %v326_v4  ;;  %v305_v29 = vld [vmem:[%s1445_s22 + $0xb0] sm:$0xff]  ;;  %v290_v30 = vld [vmem:[%s1445_s22 + $0x38] sm:$0xff]  ;;  %v291_v32 = vld [vmem:[%s1445_s22 + $0x40] sm:$0xff]  ;;  %p1220_p5 = pnand %p1219_p3, %p1213_p12 }
  0x47   : > { %977 = vmatprep.subr.mxu0 %v325_v5  ;;  %1052 = vmatprep.subr.mxu1 %v325_v5  ;;  %v306_v31 = vld [vmem:[%s1445_s22 + $0xb8] sm:$0xff]  ;;  %v307_v33 = vld [vmem:[%s1445_s22 + $0xc0] sm:$0xff]  ;;  %v292_v34 = vld [vmem:[%s1445_s22 + $0x48] sm:$0xff] }
  0x48   : > { %978 = vmatpush3.msra.mxu0 %v325_v5  ;;  %1068 = vmatpush3.msra.mxu1 %v325_v5  ;;  %v308_v35 = vld [vmem:[%s1445_s22 + $0xc8] sm:$0xff]  ;;  %v293_v36 = vld [vmem:[%s1445_s22 + $0x50] sm:$0xff]  ;;  %v294_v38 = vld [vmem:[%s1445_s22 + $0x58] sm:$0xff] }
  0x49   : > { %979 = vmatprep.subr.mxu0 %v324_v6  ;;  %1053 = vmatprep.subr.mxu1 %v324_v6  ;;  %v309_v37 = vld [vmem:[%s1445_s22 + $0xd0] sm:$0xff]  ;;  %v310_v39 = vld [vmem:[%s1445_s22 + $0xd8] sm:$0xff]  ;;  %v295_v40 = vld [vmem:[%s1445_s22 + $0x60] sm:$0xff] }
  0x4a   : > { %980 = vmatpush3.msra.mxu0 %v324_v6  ;;  %1069 = vmatpush3.msra.mxu1 %v324_v6  ;;  %v311_v41 = vld [vmem:[%s1445_s22 + $0xe0] sm:$0xff]  ;;  %v296_v42 = vld [vmem:[%s1445_s22 + $0x68] sm:$0xff]  ;;  %v297_v44 = vld [vmem:[%s1445_s22 + $0x70] sm:$0xff] }
  0x4b   : > { %981 = vmatprep.subr.mxu0 %v323_v7  ;;  %1054 = vmatprep.subr.mxu1 %v323_v7  ;;  %v312_v43 = vld [vmem:[%s1445_s22 + $0xe8] sm:$0xff]  ;;  %v313_v45 = vld [vmem:[%s1445_s22 + $0xf0] sm:$0xff]  ;;  %v298_v46 = vld [vmem:[%s1445_s22 + $0x78] sm:$0xff] }
  0x4c   : > { %982 = vmatpush3.msra.mxu0 %v323_v7  ;;  %1070 = vmatpush3.msra.mxu1 %v323_v7  ;;  %v314_v47 = vld [vmem:[%s1445_s22 + $0xf8] sm:$0xff] }
  0x4d   : > { %983 = vmatprep.subr.mxu0 %v322_v8  ;;  %1055 = vmatprep.subr.mxu1 %v322_v8 }
  0x4e   : > { %984 = vmatpush3.msra.mxu0 %v322_v8  ;;  %1071 = vmatpush3.msra.mxu1 %v322_v8 }
  0x4f   : > { %985 = vmatprep.subr.mxu0 %v321_v9  ;;  %1056 = vmatprep.subr.mxu1 %v321_v9 }
  0x50   : > { %986 = vmatpush3.msra.mxu0 %v321_v9  ;;  %1072 = vmatpush3.msra.mxu1 %v321_v9 }
  0x51   : > { %987 = vmatprep.subr.mxu0 %v320_v10  ;;  %1057 = vmatprep.subr.mxu1 %v320_v10 }
  0x52   : > { %988 = vmatpush3.msra.mxu0 %v320_v10  ;;  %1073 = vmatpush3.msra.mxu1 %v320_v10 }
  0x53   : > { %989 = vmatprep.subr.mxu0 %v319_v11  ;;  %1058 = vmatprep.subr.mxu1 %v319_v11 }
  0x54   : > { %990 = vmatpush3.msra.mxu0 %v319_v11  ;;  %1074 = vmatpush3.msra.mxu1 %v319_v11 }
  0x55   : > { %991 = vmatprep.subr.mxu0 %v318_v12  ;;  %1059 = vmatprep.subr.mxu1 %v318_v12 }
  0x56   : > { %992 = vmatpush3.msra.mxu0 %v318_v12  ;;  %1075 = vmatpush3.msra.mxu1 %v318_v12 }
  0x57   : > { %993 = vmatprep.subr.mxu0 %v317_v13  ;;  %1060 = vmatprep.subr.mxu1 %v317_v13 }
  0x58   : > { %994 = vmatpush3.msra.mxu0 %v317_v13  ;;  %1076 = vmatpush3.msra.mxu1 %v317_v13 }
  0x59   : > { %995 = vmatprep.subr.mxu0 %v316_v14  ;;  %1061 = vmatprep.subr.mxu1 %v316_v14 }
  0x5a   : > { %996 = vmatpush3.msra.mxu0 %v316_v14  ;;  %1077 = vmatpush3.msra.mxu1 %v316_v14 }
  0x5b   : > { %997 = vmatprep.subr.mxu0 %v315_v15  ;;  %1062 = vmatprep.subr.mxu1 %v315_v15 }
  0x5c   : > { %998 = vmatpush3.msra.mxu0 %v315_v15  ;;  %1078 = vmatpush3.msra.mxu1 %v315_v15 }
  0x5d   : > { %999 = vmatprep.mubr.f32.mxu0 %v283_v16  ;;  %1023 = vmatprep.mubr.f32.mxu1 %v299_v17 }
  0x5e   : > { %1000 = vmatmul.mubr.f32.vlgmr.msra.gmra.mxu0 %v284_v18  ;;  %1024 = vmatmul.mubr.f32.vlgmr.msra.gmra.mxu1 %v300_v19 }
  0x5f   : > { %1002 = vmatprep.mubr.f32.mxu0 %v285_v20  ;;  %1026 = vmatprep.mubr.f32.mxu1 %v301_v21 }
  0x62   : > { %1003 = vmatmul.mubr.f32.gmra.mxu0 %v286_v22  ;;  %1027 = vmatmul.mubr.f32.gmra.mxu1 %v302_v23 }
  0x63   : > { %1005 = vmatprep.mubr.f32.mxu0 %v287_v24  ;;  %1029 = vmatprep.mubr.f32.mxu1 %v303_v25 }
  0x66   : > { %1006 = vmatmul.mubr.f32.gmra.mxu0 %v288_v26  ;;  %1030 = vmatmul.mubr.f32.gmra.mxu1 %v304_v27 }
  0x67   : > { %1008 = vmatprep.mubr.f32.mxu0 %v289_v28  ;;  %1032 = vmatprep.mubr.f32.mxu1 %v305_v29 }
  0x6a   : > { %1009 = vmatmul.mubr.f32.gmra.mxu0 %v290_v30  ;;  %1033 = vmatmul.mubr.f32.gmra.mxu1 %v306_v31 }
  0x6b   : > { %1011 = vmatprep.mubr.f32.mxu0 %v291_v32  ;;  %1035 = vmatprep.mubr.f32.mxu1 %v307_v33 }
  0x6e   : > { %1012 = vmatmul.mubr.f32.gmra.mxu0 %v292_v34  ;;  %1036 = vmatmul.mubr.f32.gmra.mxu1 %v308_v35 }
  0x6f   : > { %1014 = vmatprep.mubr.f32.mxu0 %v293_v36  ;;  %1038 = vmatprep.mubr.f32.mxu1 %v309_v37 }
  0x72   : > { %1015 = vmatmul.mubr.f32.gmra.mxu0 %v294_v38  ;;  %1039 = vmatmul.mubr.f32.gmra.mxu1 %v310_v39 }
  0x73   : > { %1017 = vmatprep.mubr.f32.mxu0 %v295_v40  ;;  %1041 = vmatprep.mubr.f32.mxu1 %v311_v41 }
  0x76   : > { %1018 = vmatmul.mubr.f32.gmra.mxu0 %v296_v42  ;;  %1042 = vmatmul.mubr.f32.gmra.mxu1 %v312_v43 }
  0x77   : > { %1020 = vmatprep.mubr.f32.mxu0 %v297_v44  ;;  %1044 = vmatprep.mubr.f32.mxu1 %v313_v45 }
  0x7a   : > { %1021 = vmatmul.mubr.f32.gmra.mxu0 %v298_v46  ;;  %1045 = vmatmul.mubr.f32.gmra.mxu1 %v314_v47 }
 0x11e   : > { %v1001_v48 = vpop.f32.mrf.mxu0  ;;  %v1025_v49 = vpop.f32.mrf.mxu1 }
 0x11f   : > { %vm656_vm0 = vcmp.ge.f32.partialorder %v1001_v48, 0.0  ;;  %v688_v50 = vmul.f32 0.2, %v1001_v48  ;;  %vm672_vm1 = vcmp.ge.f32.partialorder %v1025_v49, 0.0  ;;  %v704_v51 = vmul.f32 0.2, %v1025_v49 }
 0x120   : > { %v397_v52 = vpop.f32.mrf.mxu0  ;;  %v477_v53 = vpop.f32.mrf.mxu1 }
 0x121   : > { %v720_v54 = vsel %vm656_vm0, %v1001_v48, %v688_v50  ;;  %v736_v55 = vsel %vm672_vm1, %v1025_v49, %v704_v51  ;;  %vm655_vm2 = vcmp.ge.f32.partialorder %v397_v52, 0.0  ;;  %v687_v56 = vmul.f32 0.2, %v397_v52 }
 0x122   : > { %752 = vst [vmem:[%s1489_s17 + $0x8] sm:$0xff] %v720_v54  ;;  %768 = vst [vmem:[%s1489_s17 + $0x88] sm:$0xff] %v736_v55  ;;  %vm671_vm3 = vcmp.ge.f32.partialorder %v477_v53, 0.0  ;;  %v703_v57 = vmul.f32 0.2, %v477_v53  ;;  %v1004_v58 = vpop.f32.mrf.mxu0  ;;  %v1028_v59 = vpop.f32.mrf.mxu1 }
 0x123   : > { %v719_v60 = vsel %vm655_vm2, %v397_v52, %v687_v56  ;;  %vm658_vm4 = vcmp.ge.f32.partialorder %v1004_v58, 0.0  ;;  %v690_v61 = vmul.f32 0.2, %v1004_v58  ;;  %vm674_vm5 = vcmp.ge.f32.partialorder %v1028_v59, 0.0 }
 0x124   : > { %751 = vst [vmem:[%s1489_s17] sm:$0xff] %v719_v60  ;;  %v735_v62 = vsel %vm671_vm3, %v477_v53, %v703_v57  ;;  %v706_v63 = vmul.f32 0.2, %v1028_v59  ;;  %v407_v0 = vpop.f32.mrf.mxu0  ;;  %v487_v1 = vpop.f32.mrf.mxu1 }
 0x125   : > { %767 = vst [vmem:[%s1489_s17 + $0x80] sm:$0xff] %v735_v62  ;;  %v722_v2 = vsel %vm658_vm4, %v1004_v58, %v690_v61  ;;  %vm657_vm6 = vcmp.ge.f32.partialorder %v407_v0, 0.0  ;;  %v689_v3 = vmul.f32 0.2, %v407_v0  ;;  %vm673_vm7 = vcmp.ge.f32.partialorder %v487_v1, 0.0 }
 0x126   : > { %754 = vst [vmem:[%s1489_s17 + $0x18] sm:$0xff] %v722_v2  ;;  %v738_v4 = vsel %vm674_vm5, %v1028_v59, %v706_v63  ;;  %v705_v5 = vmul.f32 0.2, %v487_v1  ;;  %v1007_v6 = vpop.f32.mrf.mxu0  ;;  %v1031_v7 = vpop.f32.mrf.mxu1 }
 0x127   : > { %770 = vst [vmem:[%s1489_s17 + $0x98] sm:$0xff] %v738_v4  ;;  %v721_v8 = vsel %vm657_vm6, %v407_v0, %v689_v3  ;;  %vm660_vm8 = vcmp.ge.f32.partialorder %v1007_v6, 0.0  ;;  %v692_v9 = vmul.f32 0.2, %v1007_v6  ;;  %vm676_vm9 = vcmp.ge.f32.partialorder %v1031_v7, 0.0 }
 0x128   : > { %753 = vst [vmem:[%s1489_s17 + $0x10] sm:$0xff] %v721_v8  ;;  %v737_v10 = vsel %vm673_vm7, %v487_v1, %v705_v5  ;;  %v708_v11 = vmul.f32 0.2, %v1031_v7  ;;  %v417_v12 = vpop.f32.mrf.mxu0  ;;  %v497_v13 = vpop.f32.mrf.mxu1 }
 0x129   : > { %769 = vst [vmem:[%s1489_s17 + $0x90] sm:$0xff] %v737_v10  ;;  %v724_v14 = vsel %vm660_vm8, %v1007_v6, %v692_v9  ;;  %vm659_vm10 = vcmp.ge.f32.partialorder %v417_v12, 0.0  ;;  %v691_v15 = vmul.f32 0.2, %v417_v12  ;;  %vm675_vm11 = vcmp.ge.f32.partialorder %v497_v13, 0.0 }
 0x12a   : > { %756 = vst [vmem:[%s1489_s17 + $0x28] sm:$0xff] %v724_v14  ;;  %v740_v16 = vsel %vm676_vm9, %v1031_v7, %v708_v11  ;;  %v707_v17 = vmul.f32 0.2, %v497_v13  ;;  %v1010_v18 = vpop.f32.mrf.mxu0  ;;  %v1034_v19 = vpop.f32.mrf.mxu1 }
 0x12b   : > { %772 = vst [vmem:[%s1489_s17 + $0xa8] sm:$0xff] %v740_v16  ;;  %v723_v20 = vsel %vm659_vm10, %v417_v12, %v691_v15  ;;  %vm662_vm12 = vcmp.ge.f32.partialorder %v1010_v18, 0.0  ;;  %v694_v21 = vmul.f32 0.2, %v1010_v18  ;;  %vm678_vm13 = vcmp.ge.f32.partialorder %v1034_v19, 0.0 }
 0x12c   : > { %755 = vst [vmem:[%s1489_s17 + $0x20] sm:$0xff] %v723_v20  ;;  %v739_v22 = vsel %vm675_vm11, %v497_v13, %v707_v17  ;;  %v710_v23 = vmul.f32 0.2, %v1034_v19  ;;  %v427_v24 = vpop.f32.mrf.mxu0  ;;  %v507_v25 = vpop.f32.mrf.mxu1 }
 0x12d   : > { %771 = vst [vmem:[%s1489_s17 + $0xa0] sm:$0xff] %v739_v22  ;;  %v726_v26 = vsel %vm662_vm12, %v1010_v18, %v694_v21  ;;  %vm661_vm14 = vcmp.ge.f32.partialorder %v427_v24, 0.0  ;;  %v693_v27 = vmul.f32 0.2, %v427_v24  ;;  %vm677_vm15 = vcmp.ge.f32.partialorder %v507_v25, 0.0 }
 0x12e   : > { %758 = vst [vmem:[%s1489_s17 + $0x38] sm:$0xff] %v726_v26  ;;  %v742_v28 = vsel %vm678_vm13, %v1034_v19, %v710_v23  ;;  %v709_v29 = vmul.f32 0.2, %v507_v25  ;;  %v1013_v30 = vpop.f32.mrf.mxu0  ;;  %v1037_v31 = vpop.f32.mrf.mxu1 }
 0x12f   : > { %774 = vst [vmem:[%s1489_s17 + $0xb8] sm:$0xff] %v742_v28  ;;  %v725_v32 = vsel %vm661_vm14, %v427_v24, %v693_v27  ;;  %vm664_vm0 = vcmp.ge.f32.partialorder %v1013_v30, 0.0  ;;  %v696_v33 = vmul.f32 0.2, %v1013_v30  ;;  %vm680_vm1 = vcmp.ge.f32.partialorder %v1037_v31, 0.0 }
 0x130   : > { %757 = vst [vmem:[%s1489_s17 + $0x30] sm:$0xff] %v725_v32  ;;  %v741_v34 = vsel %vm677_vm15, %v507_v25, %v709_v29  ;;  %v712_v35 = vmul.f32 0.2, %v1037_v31  ;;  %v437_v36 = vpop.f32.mrf.mxu0  ;;  %v517_v37 = vpop.f32.mrf.mxu1 }
 0x131   : > { %773 = vst [vmem:[%s1489_s17 + $0xb0] sm:$0xff] %v741_v34  ;;  %v728_v38 = vsel %vm664_vm0, %v1013_v30, %v696_v33  ;;  %vm663_vm2 = vcmp.ge.f32.partialorder %v437_v36, 0.0  ;;  %v695_v39 = vmul.f32 0.2, %v437_v36  ;;  %vm679_vm3 = vcmp.ge.f32.partialorder %v517_v37, 0.0 }
 0x132   : > { %760 = vst [vmem:[%s1489_s17 + $0x48] sm:$0xff] %v728_v38  ;;  %v744_v40 = vsel %vm680_vm1, %v1037_v31, %v712_v35  ;;  %v711_v41 = vmul.f32 0.2, %v517_v37  ;;  %v1016_v42 = vpop.f32.mrf.mxu0  ;;  %v1040_v43 = vpop.f32.mrf.mxu1 }
 0x133   : > { %776 = vst [vmem:[%s1489_s17 + $0xc8] sm:$0xff] %v744_v40  ;;  %v727_v44 = vsel %vm663_vm2, %v437_v36, %v695_v39  ;;  %vm666_vm4 = vcmp.ge.f32.partialorder %v1016_v42, 0.0  ;;  %v698_v45 = vmul.f32 0.2, %v1016_v42  ;;  %vm682_vm5 = vcmp.ge.f32.partialorder %v1040_v43, 0.0 }
 0x134   : > { %759 = vst [vmem:[%s1489_s17 + $0x40] sm:$0xff] %v727_v44  ;;  %v743_v46 = vsel %vm679_vm3, %v517_v37, %v711_v41  ;;  %v714_v47 = vmul.f32 0.2, %v1040_v43  ;;  %v447_v48 = vpop.f32.mrf.mxu0  ;;  %v527_v49 = vpop.f32.mrf.mxu1 }
 0x135   : > { %775 = vst [vmem:[%s1489_s17 + $0xc0] sm:$0xff] %v743_v46  ;;  %v730_v50 = vsel %vm666_vm4, %v1016_v42, %v698_v45  ;;  %vm665_vm6 = vcmp.ge.f32.partialorder %v447_v48, 0.0  ;;  %v697_v51 = vmul.f32 0.2, %v447_v48  ;;  %vm681_vm7 = vcmp.ge.f32.partialorder %v527_v49, 0.0 }
 0x136   : > { %762 = vst [vmem:[%s1489_s17 + $0x58] sm:$0xff] %v730_v50  ;;  %v746_v52 = vsel %vm682_vm5, %v1040_v43, %v714_v47  ;;  %v713_v53 = vmul.f32 0.2, %v527_v49  ;;  %v1019_v54 = vpop.f32.mrf.mxu0  ;;  %v1043_v55 = vpop.f32.mrf.mxu1 }
 0x137   : > { %778 = vst [vmem:[%s1489_s17 + $0xd8] sm:$0xff] %v746_v52  ;;  %v729_v56 = vsel %vm665_vm6, %v447_v48, %v697_v51  ;;  %vm668_vm8 = vcmp.ge.f32.partialorder %v1019_v54, 0.0  ;;  %v700_v57 = vmul.f32 0.2, %v1019_v54  ;;  %vm684_vm9 = vcmp.ge.f32.partialorder %v1043_v55, 0.0 }
 0x138   : > { %761 = vst [vmem:[%s1489_s17 + $0x50] sm:$0xff] %v729_v56  ;;  %v745_v58 = vsel %vm681_vm7, %v527_v49, %v713_v53  ;;  %v716_v59 = vmul.f32 0.2, %v1043_v55  ;;  %v457_v60 = vpop.f32.mrf.mxu0  ;;  %v537_v61 = vpop.f32.mrf.mxu1 }
 0x139   : > { %777 = vst [vmem:[%s1489_s17 + $0xd0] sm:$0xff] %v745_v58  ;;  %v732_v62 = vsel %vm668_vm8, %v1019_v54, %v700_v57  ;;  %vm667_vm10 = vcmp.ge.f32.partialorder %v457_v60, 0.0  ;;  %v699_v63 = vmul.f32 0.2, %v457_v60  ;;  %vm683_vm11 = vcmp.ge.f32.partialorder %v537_v61, 0.0 }
 0x13a   : > { %764 = vst [vmem:[%s1489_s17 + $0x68] sm:$0xff] %v732_v62  ;;  %v748_v0 = vsel %vm684_vm9, %v1043_v55, %v716_v59  ;;  %v715_v1 = vmul.f32 0.2, %v537_v61  ;;  %v1022_v2 = vpop.f32.mrf.mxu0  ;;  %v1046_v3 = vpop.f32.mrf.mxu1 }
 0x13b   : > { %780 = vst [vmem:[%s1489_s17 + $0xe8] sm:$0xff] %v748_v0  ;;  %v731_v4 = vsel %vm667_vm10, %v457_v60, %v699_v63  ;;  %vm670_vm12 = vcmp.ge.f32.partialorder %v1022_v2, 0.0  ;;  %v702_v5 = vmul.f32 0.2, %v1022_v2  ;;  %vm686_vm13 = vcmp.ge.f32.partialorder %v1046_v3, 0.0 }
 0x13c   : > { %763 = vst [vmem:[%s1489_s17 + $0x60] sm:$0xff] %v731_v4  ;;  %v747_v6 = vsel %vm683_vm11, %v537_v61, %v715_v1  ;;  %v718_v7 = vmul.f32 0.2, %v1046_v3  ;;  %v467_v8 = vpop.f32.mrf.mxu0  ;;  %v547_v9 = vpop.f32.mrf.mxu1 }
 0x13d   : > { %779 = vst [vmem:[%s1489_s17 + $0xe0] sm:$0xff] %v747_v6  ;;  %v734_v10 = vsel %vm670_vm12, %v1022_v2, %v702_v5  ;;  %vm669_vm14 = vcmp.ge.f32.partialorder %v467_v8, 0.0  ;;  %v701_v11 = vmul.f32 0.2, %v467_v8  ;;  %vm685_vm15 = vcmp.ge.f32.partialorder %v547_v9, 0.0 }
 0x13e   : > { %766 = vst [vmem:[%s1489_s17 + $0x78] sm:$0xff] %v734_v10  ;;  %v750_v12 = vsel %vm686_vm13, %v1046_v3, %v718_v7  ;;  %v717_v13 = vmul.f32 0.2, %v547_v9 }
 0x13f   : > { %782 = vst [vmem:[%s1489_s17 + $0xf8] sm:$0xff] %v750_v12  ;;  %v733_v14 = vsel %vm669_vm14, %v467_v8, %v701_v11 }
 0x140   : > { %765 = vst [vmem:[%s1489_s17 + $0x70] sm:$0xff] %v733_v14  ;;  %v749_v15 = vsel %vm685_vm15, %v547_v9, %v717_v13 }
 0x141   : > { %781 = vst [vmem:[%s1489_s17 + $0xf0] sm:$0xff] %v749_v15 }
 0x142   : > { %1223 = shalt.err (!%p1220_p5)
}
 0x143   : > { %s1224_s6 = scalar_lea.hbm %s1525_s23, 4096  ;;  %s1228_s4 = scalar_lea.hbm %s1580_s2, 8192 }
 0x144   : > { %p1225_p7 = scmp.ne.s32.totalorder %s1525_s23, %s1224_s6  ;;  %p1229_p9 = scmp.lt.s32.totalorder %s1525_s23, %s1580_s2 }
 0x145   : > { %p1230_p11 = scmp.lt.s32.totalorder %s1228_s4, %s1224_s6 }
 0x146   : > { %p1226_p4 = pnand %p1225_p7, %p1408_p13 }
 0x147   : > { %p1231_p10 = por %p1230_p11, %p1229_p9 }
 0x148   : > { %p1227_p6 = pneg %p1226_p4 }
 0x14a   : > { %p1232_p1 = pnand %p1231_p10, %p1227_p6 }
 0x14c   : > { %1235 = shalt.err (!%p1232_p1)
}
 0x14d   : > { %s1301_s22 = smov 128   ;;  %s1302_s17 = smov 8  }
 0x14e   : > { %1085 = dma.vmem_to_hbm [thread:$0]  (%p1408_p13), %s1527_s21, 4096, %s1525_s23, %s784_s24, %s1301_s22, %s1301_s22, %s1302_s17  }
 0x14f PF: > { %s813_s19 = sand.u32 1, %s1274_s9   ;;  %p1594_p8 = scmp.ne.s32.totalorder %s1586_s20, 0 }
 0x150   : > { %p1595_p12 = scmp.ge.s32.totalorder %s1294_s14, 2  ;;  %s814_s12 = scalar_lea.sflag [#allocation5], %s813_s19 }
 0x152   : > { %p1096_p0 = pnand %p1595_p12, %p1594_p8 }
 0x154   : > { %p1097_p2 = pneg %p1096_p0 }
 0x156   : > { %1269 = dma.done.wait (%p1097_p2), %s814_s12, 4096  }
 0x157   : > { %1271 = vsyncadd (%p1097_p2), %s814_s12, 4294963200  ;;  %s19_s14 = sadd.s32 1, %s1294_s14   ;;  %s1596_s9 = smov %s1278_s10 }
 0x158   : > { %p16_p3 = scmp.ge.s32.totalorder %s19_s14, 4   ;;  %s1597_s10 = smov %s1282_s11 }
 0x159   : > { %s1598_s11 = smov %s1417_s15  ;;  %s1599_s12 = smov %s1290_s13 }
 0x15a   : > { %s1600_s13 = smov %s1602_s25  ;;  %18 = sbr.rel (!%p16_p3) target bundleno = 7 (0x7), region = 86 }
 0x15f   :  { %819 = vsyncpa [#allocation4], 1 }
 0x160   :  { %821 = vsyncpa [#allocation4 + $0x1], 1 }
 0x161   :  { %822 = vsyncpa [#allocation7], 1 }
 0x162   :  { %823 = vsyncpa [#allocation5], 1 }
 0x163   :  { %825 = vsyncpa [#allocation5 + $0x1], 1 }

</bundles_post_ra>
